<compile_context>
chip_gen: v7x
topology: tpu7x:2x2x1
jax: 0.10.0
libtpu: 0.0.40
codegen_flags: <defaults>
</compile_context>

<pallas_src>
import math

import numpy as np
import jax
import jax.numpy as jnp
from jax.experimental import pallas as pl
from jax.experimental.pallas import tpu as pltpu


def _round_up(x, m):
    return ((x + m - 1) // m) * m


# ------------------------------------------------------------------ kernel

def _make_kernel(*, Nr, d_k, A_real, A_pad, KQ_pad, P_pad, sum_pairs):
    d_kq = Nr * d_k
    dv = A_real // Nr
    inv_sqrt_dk = 1.0 / math.sqrt(d_k)
    KV = KQ_pad + A_pad                    # lane offset of the Q block
    f32 = jnp.float32
    bf16 = jnp.bfloat16

    def kernel(a_ref, g_ref, wkqv_ref, bkqv_ref, wg_ref, bg_ref, conv_ref,
               src_ref, tgt_ref, tgtrow_ref, out_ref):
        # ---- fused projections (bf16 MXU operands, f32 accumulate) --------
        # Weight layout [K | V(identity) | Q]; every block starts on a
        # 128-lane boundary so the splits below are free aligned slices.
        a_bf = a_ref[...]                                            # (Pp, Ap) bf16
        kqv = (jnp.dot(a_bf, wkqv_ref[...], preferred_element_type=f32)
               + bkqv_ref[...])                                      # (Pp, 2*KQp+Ap) f32
        kv_bf = kqv[:, :KV].astype(bf16)                             # [K | V]
        q_bf = kqv[:, KV:].astype(bf16)                              # [Q]

        # fc_g + Threshold(1e-6, 1e-6) + log.  Kept f32: log() of values near
        # the threshold is precision sensitive and this dot is tiny.
        gw = (jnp.dot(g_ref[...], wg_ref[...], preferred_element_type=f32)
              + bg_ref[...])
        log_g = jnp.log(jnp.maximum(gw, f32(1e-6)))                  # (SumPairs, Nr)

        # ---- pair-bookkeeping selectors built in-kernel (iota + compare) --
        # Exact 0/1 values, so bf16 MXU operands are lossless.
        obj_lane = jax.lax.broadcasted_iota(jnp.int32, (sum_pairs, P_pad), 1)
        rep = jnp.where(obj_lane == src_ref[...], 1.0, 0.0).astype(bf16)   # pair -> source a
        tile = jnp.where(obj_lane == tgt_ref[...], 1.0, 0.0).astype(bf16)  # pair -> target j
        obj_row = jax.lax.broadcasted_iota(jnp.int32, (P_pad, sum_pairs), 0)
        selt = jnp.where(obj_row == tgtrow_ref[...], 1.0, 0.0).astype(bf16)  # == tile^T

        col = jax.lax.broadcasted_iota(jnp.int32, (KQ_pad, Nr), 0)
        hed = jax.lax.broadcasted_iota(jnp.int32, (KQ_pad, Nr), 1)
        r_sel = jnp.where((col >= hed * d_k) & (col < (hed + 1) * d_k),
                          1.0, 0.0).astype(bf16)                      # (KQp, Nr): lane -> head
        lane = jax.lax.broadcasted_iota(jnp.int32, (Nr, A_pad), 1)
        hrow = jax.lax.broadcasted_iota(jnp.int32, (Nr, A_pad), 0)
        expand = jnp.where((lane >= hrow * dv) & (lane < (hrow + 1) * dv),
                           1.0, 0.0).astype(bf16)                     # (Nr, Ap): head -> dv lanes

        # ---- batched relation attention (all images, block-diagonal) ------
        kv_exp = jnp.dot(rep, kv_bf, preferred_element_type=f32)     # (SumPairs, 2*KQp)
        k_exp = kv_exp[:, :KQ_pad]                                   # aligned slices
        v_exp = kv_exp[:, KQ_pad:]
        q_exp = jnp.dot(tile, q_bf, preferred_element_type=f32)      # (SumPairs, KQp)

        # scores[p, r] = <k[src(p), r, :], q[tgt(p), r, :]> / sqrt(d_k)
        prod = (k_exp * q_exp).astype(bf16)
        scores = jnp.dot(prod, r_sel, preferred_element_type=f32) * inv_sqrt_dk
        logits = log_g + scores                                      # (SumPairs, Nr) f32

        # Softmax over source objects.  Each softmax column is one
        # (image, target, head) group; a per-head global max is a constant
        # shift per column, so it keeps exp() bounded without changing the
        # result.  All elementwise math stays f32.
        m = jnp.max(logits, axis=0, keepdims=True)                   # (1, Nr)
        ex = jnp.exp(logits - m)                                     # (SumPairs, Nr) f32
        ex_bf = ex.astype(bf16)

        denom = jnp.dot(selt, ex_bf, preferred_element_type=f32)     # (Pp, Nr)
        ex_big = jnp.dot(ex_bf, expand, preferred_element_type=f32)  # (SumPairs, Ap)
        wv = (ex_big * v_exp).astype(bf16)
        unnorm = jnp.dot(selt, wv, preferred_element_type=f32)       # (Pp, Ap)

        # EUP reciprocal; clamp keeps the all-zero padded rows finite.  This
        # chain is independent of the `unnorm` chain after `ex`, so it can
        # overlap rather than gate the final store.
        rec_h = pl.reciprocal(jnp.maximum(denom, f32(1e-30)), approx=True)
        rec = jnp.dot(rec_h.astype(bf16), expand,
                      preferred_element_type=f32)                    # (Pp, Ap)

        # 1x1 Conv1d affine folded into ONE unmasked, lane-dense store.
        out_ref[...] = unnorm * rec * conv_ref[0] + conv_ref[1]

    return kernel


# ------------------------------------------------------------------ wrapper

def relation_net_forward(params, a_features, g_features, split,
                         rel_pair_counts, *, Nr, d_k):
    # split / rel_pair_counts are Python-static (mirrors the PyTorch loop).
    split = tuple((int(s), int(e)) for s, e in split)
    pair_off = tuple(int(x) for x in rel_pair_counts)
    P, A = a_features.shape
    sum_pairs, d_g = g_features.shape
    d_kq = Nr * d_k

    # Lane/sublane padding so every block boundary and the output store are
    # tile-aligned (single unmasked store; aligned K/V/Q splits).
    P_pad = _round_up(max(P, 8), 8)
    A_pad = _round_up(max(A, 128), 128)
    KQ_pad = _round_up(max(d_kq, 128), 128)
    W_total = 2 * KQ_pad + A_pad

    # bf16 MXU operands (elementwise math stays f32 inside the kernel).
    a_pad = jnp.zeros((P_pad, A_pad), jnp.float32).at[:P, :A].set(a_features)
    a_pad = a_pad.astype(jnp.bfloat16)

    # Projection weights, layout [K | V(identity) | Q], zero-padded lanes.
    w_kqv = np.zeros((A_pad, W_total), np.float32)
    w_kqv[:A, :d_kq] = np.asarray(params["W_K"], np.float32)
    w_kqv[np.arange(A), KQ_pad + np.arange(A)] = 1.0          # V = a passthrough
    w_kqv[:A, KQ_pad + A_pad:KQ_pad + A_pad + d_kq] = np.asarray(
        params["W_Q"], np.float32)
    b_kqv = np.zeros((1, W_total), np.float32)
    b_kqv[:, :d_kq] = np.asarray(params["b_K"], np.float32)
    b_kqv[:, KQ_pad + A_pad:KQ_pad + A_pad + d_kq] = np.asarray(
        params["b_Q"], np.float32)

    conv = jnp.concatenate([params["conv_w"].reshape(-1),
                            params["conv_b"].reshape(-1)]).astype(jnp.float32)

    # Per-pair global (source, target) object indices: the only per-image
    # data the kernel needs (selectors are rebuilt in-kernel with iota).
    src = np.zeros((sum_pairs, 1), np.int32)
    tgt = np.zeros((sum_pairs, 1), np.int32)
    for i, (s, e) in enumerate(split):
        n = e - s
        p = np.arange(n * n)
        src[pair_off[i]:pair_off[i + 1], 0] = s + p // n
        tgt[pair_off[i]:pair_off[i + 1], 0] = s + p % n
    tgt_row = tgt.reshape(1, sum_pairs)

    kernel = _make_kernel(Nr=Nr, d_k=d_k, A_real=A, A_pad=A_pad,
                          KQ_pad=KQ_pad, P_pad=P_pad, sum_pairs=sum_pairs)

    vmem = pl.BlockSpec(memory_space=pltpu.MemorySpace.VMEM)
    smem = pl.BlockSpec(memory_space=pltpu.MemorySpace.SMEM)
    out = pl.pallas_call(
        kernel,
        out_shape=jax.ShapeDtypeStruct((P_pad, A_pad), jnp.float32),
        in_specs=[vmem, vmem, vmem, vmem, vmem, vmem, smem, vmem, vmem, vmem],
        out_specs=vmem,
        compiler_params=pltpu.CompilerParams(
            vmem_limit_bytes=32 * 1024 * 1024),
    )(a_pad,
      g_features.astype(jnp.float32),
      jnp.asarray(w_kqv, jnp.bfloat16),
      jnp.asarray(b_kqv, jnp.float32),
      params["W_g"].astype(jnp.float32),
      params["b_g"].astype(jnp.float32),
      conv,
      jnp.asarray(src), jnp.asarray(tgt), jnp.asarray(tgt_row))
    return out[:P, :A]


# ------------------------------------------------------------------ reference

def relation_net_reference(params, a_features, g_features, split,
                           rel_pair_counts, *, Nr, d_k):
    P, A = a_features.shape
    dv = A // Nr
    g_w = g_features @ params["W_g"] + params["b_g"]
    g_w = jnp.where(g_w > 1e-6, g_w, 1e-6).T
    k = (a_features @ params["W_K"] + params["b_K"]).reshape(P, Nr, d_k)
    q = (a_features @ params["W_Q"] + params["b_Q"]).reshape(P, Nr, d_k)
    k = k.transpose(1, 0, 2)
    q = q.transpose(1, 0, 2)
    v = a_features.reshape(P, Nr, dv).transpose(1, 0, 2)
    outs = []
    for i, (s, e) in enumerate(split):
        n = e - s
        kk, qq, vv = k[:, s:e], q[:, s:e], v[:, s:e]
        gg = g_w[:, rel_pair_counts[i]:rel_pair_counts[i + 1]].reshape(Nr, n, n)
        aw = jnp.einsum("rik,rjk->rij", kk, qq) / math.sqrt(d_k)
        fin = jax.nn.softmax(jnp.log(gg) + aw, axis=1)
        r = jnp.einsum("rid,rij->rdj", vv, fin)                  # (Nr, dv, n)
        outs.append(r.reshape(Nr * dv, n).T)
    rf = jnp.concatenate(outs, axis=0)
    return rf * params["conv_w"] + params["conv_b"]


# ------------------------------------------------------------------ main

if __name__ == "__main__":
    Nr, d_k, d_g, A = 4, 8, 16, 64           # a_feature_length = 64, dv = 16
    split = [(0, 8), (8, 12)]                # 8 objects in image 0, 4 in image 1
    P = split[-1][1]
    rel_pair_counts = [0]
    for s, e in split:
        n = e - s
        rel_pair_counts.append(rel_pair_counts[-1] + n * n)
    sum_pairs = rel_pair_counts[-1]          # 64 + 16 = 80

    key = jax.random.PRNGKey(0)
    ka, kg, k1, k2, k3, k4, k5, k6, k7, k8 = jax.random.split(key, 10)
    a_features = jax.random.normal(ka, (P, A), jnp.float32)
    g_features = jax.random.uniform(kg, (sum_pairs, d_g), jnp.float32)

    params = {
        "W_g": jax.random.normal(k1, (d_g, Nr), jnp.float32) * 0.1,
        "b_g": jax.random.normal(k2, (1, Nr), jnp.float32) * 0.1,
        "W_K": jax.random.normal(k3, (A, Nr * d_k), jnp.float32) * 0.1,
        "b_K": jax.random.normal(k4, (1, Nr * d_k), jnp.float32) * 0.1,
        "W_Q": jax.random.normal(k5, (A, Nr * d_k), jnp.float32) * 0.1,
        "b_Q": jax.random.normal(k6, (1, Nr * d_k), jnp.float32) * 0.1,
        "conv_w": jax.random.normal(k7, (1, 1), jnp.float32),
        "conv_b": jax.random.normal(k8, (1, 1), jnp.float32),
    }

    out = relation_net_forward(params, a_features, g_features, split,
                               rel_pair_counts, Nr=Nr, d_k=d_k)
    out = jax.block_until_ready(out)

    ref = relation_net_reference(params, a_features, g_features, split,
                                 rel_pair_counts, Nr=Nr, d_k=d_k)

    assert out.shape == (P, A), out.shape
    # Tolerance budget: bf16 MXU operands (per perf review; all exp/log/
    # softmax/elementwise math stays f32) plus pl.reciprocal(approx=True)
    # give ~1% relative error w.r.t. the magnitudes flowing through the
    # computation (which include the conv_s scale), so the atol is scaled by
    # the output magnitude.
    scale = float(jnp.max(jnp.abs(ref)))
    err = float(jnp.max(jnp.abs(out - ref)))
    if not bool(jnp.allclose(out, ref, atol=2e-2 * max(scale, 1.0), rtol=2e-2)):
        raise AssertionError(
            f"Pallas output does not match JAX reference (max abs err {err})")
    print("KERNEL_OK")
</pallas_src>

<mosaic_0001>
module attributes {stable_mosaic.version = 11 : i64} {
  func.func @kernel(%arg0: memref<16x128xbf16, #tpu.memory_space<vmem>>, %arg1: memref<80x16xf32, #tpu.memory_space<vmem>>, %arg2: memref<128x384xbf16, #tpu.memory_space<vmem>>, %arg3: memref<1x384xf32, #tpu.memory_space<vmem>>, %arg4: memref<16x4xf32, #tpu.memory_space<vmem>>, %arg5: memref<1x4xf32, #tpu.memory_space<vmem>>, %arg6: memref<2xf32, #tpu.memory_space<smem>>, %arg7: memref<80x1xi32, #tpu.memory_space<vmem>>, %arg8: memref<80x1xi32, #tpu.memory_space<vmem>>, %arg9: memref<1x80xi32, #tpu.memory_space<vmem>>, %arg10: memref<16x128xf32, #tpu.memory_space<vmem>>) attributes {dimension_semantics = [], scalar_prefetch = 0 : i64, scratch_operands = 0 : i64, tpu.core_type = #tpu.core_type<tc>} {
    %c0 = arith.constant 0 : index
    %c0_0 = arith.constant 0 : index
    %0 = vector.load %arg0[%c0, %c0_0] : memref<16x128xbf16, #tpu.memory_space<vmem>>, vector<16x128xbf16>
    %c0_1 = arith.constant 0 : index
    %c0_2 = arith.constant 0 : index
    %1 = vector.load %arg2[%c0_1, %c0_2] : memref<128x384xbf16, #tpu.memory_space<vmem>>, vector<128x384xbf16>
    %cst = arith.constant dense<0.000000e+00> : vector<16x384xf32>
    %2 = tpu.matmul %0, %1, %cst {dimension_numbers = #tpu.dot_dimension_numbers<[1], [0], [0], [1], [0, 0, 1, 1], [], []>} : vector<16x128xbf16>, vector<128x384xbf16>, vector<16x384xf32> -> vector<16x384xf32>
    %c0_3 = arith.constant 0 : index
    %c0_4 = arith.constant 0 : index
    %3 = vector.load %arg3[%c0_3, %c0_4] : memref<1x384xf32, #tpu.memory_space<vmem>>, vector<1x384xf32>
    %4 = vector.broadcast %3 : vector<1x384xf32> to vector<16x384xf32>
    %5 = arith.addf %2, %4 : vector<16x384xf32>
    %6 = vector.extract_strided_slice %5 {offsets = [0, 0], sizes = [16, 256], strides = [1, 1]} : vector<16x384xf32> to vector<16x256xf32>
    %7 = arith.truncf %6 : vector<16x256xf32> to vector<16x256xbf16>
    %8 = vector.extract_strided_slice %5 {offsets = [0, 256], sizes = [16, 128], strides = [1, 1]} : vector<16x384xf32> to vector<16x128xf32>
    %9 = arith.truncf %8 : vector<16x128xf32> to vector<16x128xbf16>
    %c0_5 = arith.constant 0 : index
    %c0_6 = arith.constant 0 : index
    %10 = vector.load %arg1[%c0_5, %c0_6] : memref<80x16xf32, #tpu.memory_space<vmem>>, vector<80x16xf32>
    %c0_7 = arith.constant 0 : index
    %c0_8 = arith.constant 0 : index
    %11 = vector.load %arg4[%c0_7, %c0_8] : memref<16x4xf32, #tpu.memory_space<vmem>>, vector<16x4xf32>
    %cst_9 = arith.constant dense<0.000000e+00> : vector<80x4xf32>
    %12 = tpu.matmul %10, %11, %cst_9 {dimension_numbers = #tpu.dot_dimension_numbers<[1], [0], [0], [1], [0, 0, 1, 1], [], []>} : vector<80x16xf32>, vector<16x4xf32>, vector<80x4xf32> -> vector<80x4xf32>
    %c0_10 = arith.constant 0 : index
    %c0_11 = arith.constant 0 : index
    %13 = vector.load %arg5[%c0_10, %c0_11] : memref<1x4xf32, #tpu.memory_space<vmem>>, vector<1x4xf32>
    %14 = vector.broadcast %13 : vector<1x4xf32> to vector<80x4xf32>
    %15 = arith.addf %12, %14 : vector<80x4xf32>
    %cst_12 = arith.constant 9.99999997E-7 : f32
    %16 = vector.broadcast %cst_12 : f32 to vector<80x4xf32>
    %17 = arith.maximumf %15, %16 : vector<80x4xf32>
    %18 = math.log %17 : vector<80x4xf32>
    %19 = tpu.iota {dimensions = array<i32: 1>} : vector<80x16xi32>
    %c0_13 = arith.constant 0 : index
    %c0_14 = arith.constant 0 : index
    %20 = vector.load %arg7[%c0_13, %c0_14] : memref<80x1xi32, #tpu.memory_space<vmem>>, vector<80x1xi32>
    %21 = vector.broadcast %20 : vector<80x1xi32> to vector<80x16xi32>
    %22 = arith.cmpi eq, %19, %21 : vector<80x16xi32>
    %cst_15 = arith.constant 1.000000e+00 : f32
    %cst_16 = arith.constant 0.000000e+00 : f32
    %23 = vector.broadcast %cst_15 : f32 to vector<80x16xf32>
    %24 = vector.broadcast %cst_16 : f32 to vector<80x16xf32>
    %25 = arith.select %22, %23, %24 : vector<80x16xi1>, vector<80x16xf32>
    %26 = arith.truncf %25 : vector<80x16xf32> to vector<80x16xbf16>
    %c0_17 = arith.constant 0 : index
    %c0_18 = arith.constant 0 : index
    %27 = vector.load %arg8[%c0_17, %c0_18] : memref<80x1xi32, #tpu.memory_space<vmem>>, vector<80x1xi32>
    %28 = vector.broadcast %27 : vector<80x1xi32> to vector<80x16xi32>
    %29 = arith.cmpi eq, %19, %28 : vector<80x16xi32>
    %cst_19 = arith.constant 1.000000e+00 : f32
    %cst_20 = arith.constant 0.000000e+00 : f32
    %30 = vector.broadcast %cst_19 : f32 to vector<80x16xf32>
    %31 = vector.broadcast %cst_20 : f32 to vector<80x16xf32>
    %32 = arith.select %29, %30, %31 : vector<80x16xi1>, vector<80x16xf32>
    %33 = arith.truncf %32 : vector<80x16xf32> to vector<80x16xbf16>
    %34 = tpu.iota {dimensions = array<i32: 0>} : vector<16x80xi32>
    %c0_21 = arith.constant 0 : index
    %c0_22 = arith.constant 0 : index
    %35 = vector.load %arg9[%c0_21, %c0_22] : memref<1x80xi32, #tpu.memory_space<vmem>>, vector<1x80xi32>
    %36 = vector.broadcast %35 : vector<1x80xi32> to vector<16x80xi32>
    %37 = arith.cmpi eq, %34, %36 : vector<16x80xi32>
    %cst_23 = arith.constant 1.000000e+00 : f32
    %cst_24 = arith.constant 0.000000e+00 : f32
    %38 = vector.broadcast %cst_23 : f32 to vector<16x80xf32>
    %39 = vector.broadcast %cst_24 : f32 to vector<16x80xf32>
    %40 = arith.select %37, %38, %39 : vector<16x80xi1>, vector<16x80xf32>
    %41 = arith.truncf %40 : vector<16x80xf32> to vector<16x80xbf16>
    %42 = tpu.iota {dimensions = array<i32: 0>} : vector<128x4xi32>
    %43 = tpu.iota {dimensions = array<i32: 1>} : vector<128x4xi32>
    %c8_i32 = arith.constant 8 : i32
    %44 = vector.broadcast %c8_i32 : i32 to vector<128x4xi32>
    %45 = arith.muli %43, %44 : vector<128x4xi32>
    %46 = arith.cmpi sge, %42, %45 : vector<128x4xi32>
    %c1_i32 = arith.constant 1 : i32
    %47 = vector.broadcast %c1_i32 : i32 to vector<128x4xi32>
    %48 = arith.addi %43, %47 : vector<128x4xi32>
    %c8_i32_25 = arith.constant 8 : i32
    %49 = vector.broadcast %c8_i32_25 : i32 to vector<128x4xi32>
    %50 = arith.muli %48, %49 : vector<128x4xi32>
    %51 = arith.cmpi slt, %42, %50 : vector<128x4xi32>
    %52 = arith.andi %46, %51 : vector<128x4xi1>
    %cst_26 = arith.constant 1.000000e+00 : f32
    %cst_27 = arith.constant 0.000000e+00 : f32
    %53 = vector.broadcast %cst_26 : f32 to vector<128x4xf32>
    %54 = vector.broadcast %cst_27 : f32 to vector<128x4xf32>
    %55 = arith.select %52, %53, %54 : vector<128x4xi1>, vector<128x4xf32>
    %56 = arith.truncf %55 : vector<128x4xf32> to vector<128x4xbf16>
    %57 = tpu.iota {dimensions = array<i32: 1>} : vector<4x128xi32>
    %58 = tpu.iota {dimensions = array<i32: 0>} : vector<4x128xi32>
    %c16_i32 = arith.constant 16 : i32
    %59 = vector.broadcast %c16_i32 : i32 to vector<4x128xi32>
    %60 = arith.muli %58, %59 : vector<4x128xi32>
    %61 = arith.cmpi sge, %57, %60 : vector<4x128xi32>
    %c1_i32_28 = arith.constant 1 : i32
    %62 = vector.broadcast %c1_i32_28 : i32 to vector<4x128xi32>
    %63 = arith.addi %58, %62 : vector<4x128xi32>
    %c16_i32_29 = arith.constant 16 : i32
    %64 = vector.broadcast %c16_i32_29 : i32 to vector<4x128xi32>
    %65 = arith.muli %63, %64 : vector<4x128xi32>
    %66 = arith.cmpi slt, %57, %65 : vector<4x128xi32>
    %67 = arith.andi %61, %66 : vector<4x128xi1>
    %cst_30 = arith.constant 1.000000e+00 : f32
    %cst_31 = arith.constant 0.000000e+00 : f32
    %68 = vector.broadcast %cst_30 : f32 to vector<4x128xf32>
    %69 = vector.broadcast %cst_31 : f32 to vector<4x128xf32>
    %70 = arith.select %67, %68, %69 : vector<4x128xi1>, vector<4x128xf32>
    %71 = arith.truncf %70 : vector<4x128xf32> to vector<4x128xbf16>
    %cst_32 = arith.constant dense<0.000000e+00> : vector<80x256xf32>
    %72 = tpu.matmul %26, %7, %cst_32 {dimension_numbers = #tpu.dot_dimension_numbers<[1], [0], [0], [1], [0, 0, 1, 1], [], []>} : vector<80x16xbf16>, vector<16x256xbf16>, vector<80x256xf32> -> vector<80x256xf32>
    %73 = vector.extract_strided_slice %72 {offsets = [0, 0], sizes = [80, 128], strides = [1, 1]} : vector<80x256xf32> to vector<80x128xf32>
    %74 = vector.extract_strided_slice %72 {offsets = [0, 128], sizes = [80, 128], strides = [1, 1]} : vector<80x256xf32> to vector<80x128xf32>
    %cst_33 = arith.constant dense<0.000000e+00> : vector<80x128xf32>
    %75 = tpu.matmul %33, %9, %cst_33 {dimension_numbers = #tpu.dot_dimension_numbers<[1], [0], [0], [1], [0, 0, 1, 1], [], []>} : vector<80x16xbf16>, vector<16x128xbf16>, vector<80x128xf32> -> vector<80x128xf32>
    %76 = arith.mulf %73, %75 : vector<80x128xf32>
    %77 = arith.truncf %76 : vector<80x128xf32> to vector<80x128xbf16>
    %cst_34 = arith.constant dense<0.000000e+00> : vector<80x4xf32>
    %78 = tpu.matmul %77, %56, %cst_34 {dimension_numbers = #tpu.dot_dimension_numbers<[1], [0], [0], [1], [0, 0, 1, 1], [], []>} : vector<80x128xbf16>, vector<128x4xbf16>, vector<80x4xf32> -> vector<80x4xf32>
    %cst_35 = arith.constant 0.353553385 : f32
    %79 = vector.broadcast %cst_35 : f32 to vector<80x4xf32>
    %80 = arith.mulf %78, %79 : vector<80x4xf32>
    %81 = arith.addf %18, %80 : vector<80x4xf32>
    %cst_36 = arith.constant dense<0xFF800000> : vector<4xf32>
    %82 = vector.multi_reduction <maximumf>, %81, %cst_36 [0] : vector<80x4xf32> to vector<4xf32>
    %83 = vector.shape_cast %82 : vector<4xf32> to vector<1x4xf32>
    %84 = vector.broadcast %83 : vector<1x4xf32> to vector<80x4xf32>
    %85 = arith.subf %81, %84 : vector<80x4xf32>
    %86 = math.exp %85 : vector<80x4xf32>
    %87 = arith.truncf %86 : vector<80x4xf32> to vector<80x4xbf16>
    %cst_37 = arith.constant dense<0.000000e+00> : vector<16x4xf32>
    %88 = tpu.matmul %41, %87, %cst_37 {dimension_numbers = #tpu.dot_dimension_numbers<[1], [0], [0], [1], [0, 0, 1, 1], [], []>} : vector<16x80xbf16>, vector<80x4xbf16>, vector<16x4xf32> -> vector<16x4xf32>
    %cst_38 = arith.constant dense<0.000000e+00> : vector<80x128xf32>
    %89 = tpu.matmul %87, %71, %cst_38 {dimension_numbers = #tpu.dot_dimension_numbers<[1], [0], [0], [1], [0, 0, 1, 1], [], []>} : vector<80x4xbf16>, vector<4x128xbf16>, vector<80x128xf32> -> vector<80x128xf32>
    %90 = arith.mulf %89, %74 : vector<80x128xf32>
    %91 = arith.truncf %90 : vector<80x128xf32> to vector<80x128xbf16>
    %cst_39 = arith.constant dense<0.000000e+00> : vector<16x128xf32>
    %92 = tpu.matmul %41, %91, %cst_39 {dimension_numbers = #tpu.dot_dimension_numbers<[1], [0], [0], [1], [0, 0, 1, 1], [], []>} : vector<16x80xbf16>, vector<80x128xbf16>, vector<16x128xf32> -> vector<16x128xf32>
    %cst_40 = arith.constant 1.000000e-30 : f32
    %93 = vector.broadcast %cst_40 : f32 to vector<16x4xf32>
    %94 = arith.maximumf %88, %93 : vector<16x4xf32>
    %95 = tpu.reciprocal %94 {approx = true} : vector<16x4xf32> -> vector<16x4xf32>
    %96 = arith.truncf %95 : vector<16x4xf32> to vector<16x4xbf16>
    %cst_41 = arith.constant dense<0.000000e+00> : vector<16x128xf32>
    %97 = tpu.matmul %96, %71, %cst_41 {dimension_numbers = #tpu.dot_dimension_numbers<[1], [0], [0], [1], [0, 0, 1, 1], [], []>} : vector<16x4xbf16>, vector<4x128xbf16>, vector<16x128xf32> -> vector<16x128xf32>
    %98 = arith.mulf %92, %97 : vector<16x128xf32>
    %c0_42 = arith.constant 0 : index
    %99 = memref.load %arg6[%c0_42] : memref<2xf32, #tpu.memory_space<smem>>
    %100 = vector.broadcast %99 : f32 to vector<16x128xf32>
    %101 = arith.mulf %98, %100 : vector<16x128xf32>
    %c1 = arith.constant 1 : index
    %102 = memref.load %arg6[%c1] : memref<2xf32, #tpu.memory_space<smem>>
    %103 = vector.broadcast %102 : f32 to vector<16x128xf32>
    %104 = arith.addf %101, %103 : vector<16x128xf32>
    %c0_43 = arith.constant 0 : index
    %c0_44 = arith.constant 0 : index
    %105 = vector.load %arg10[%c0_43, %c0_44] : memref<16x128xf32, #tpu.memory_space<vmem>>, vector<16x128xf32>
    tpu.vector_store %arg10[%c0_43, %c0_44], %104 {strides = array<i32>} : memref<16x128xf32, #tpu.memory_space<vmem>>, vector<16x128xf32>,
    return
  }
}

</mosaic_0001>

<bundles_post_ra>
// kernel: tpu_custom_call.1
= control target key start
LH: loop header
LB: loop body
LE: loop exit
PB: predicated region body
PF: predicated region fallthrough
CT: control target
= control target key end

     0   :  { %15 = vsyncpa [#allocation4], 0  ;;  %s2550_s0 = inlined_call_operand.vmem [shape: bf16[16,128], index: 0, kind: input, shape index: {}]   ;;  %s2551_s1 = inlined_call_operand.vmem [shape: f32[80,16], index: 1, kind: input, shape index: {}]   ;;  %s2552_s2 = inlined_call_operand.vmem [shape: bf16[128,384], index: 2, kind: input, shape index: {}]   ;;  %s2553_s3 = inlined_call_operand.vmem [shape: f32[1,384], index: 3, kind: input, shape index: {}]   ;;  %s2554_s4 = inlined_call_operand.vmem [shape: f32[16,4], index: 4, kind: input, shape index: {}]   ;;  %s2555_s5 = inlined_call_operand.vmem [shape: f32[1,4], index: 5, kind: input, shape index: {}]   ;;  %s2556_s6 = inlined_call_operand.vmem [shape: f32[2], index: 6, kind: input, shape index: {}]   ;;  %s2557_s7 = inlined_call_operand.vmem [shape: s32[80,1], index: 7, kind: input, shape index: {}]   ;;  %s2558_s8 = inlined_call_operand.vmem [shape: s32[80,1], index: 8, kind: input, shape index: {}]   ;;  %s2559_s9 = inlined_call_operand.vmem [shape: s32[1,80], index: 9, kind: input, shape index: {}]   ;;  %s2560_s10 = inlined_call_operand.hbm [shape: f32[16,128], index: 10, kind: output, shape index: {}]  }
   0x1   :  { %16 = vsyncpa [#allocation3], 0  ;;  %s35_s15 = sshll.u32 %s2556_s6, 4  ;;  %s36_s15 = int_to_ptr.vmem [resolvable:$true] %s35_s15 }
   0x2   :  { %s1763_s16 = scalar_lea.vmem %s36_s15, 16  ;;  %p1768_p1 = scmp.lt.s32.totalorder %s36_s15, %s36_s15 }
   0x3   :  { %p1764_p0 = scmp.ne.s32.totalorder %s36_s15, %s1763_s16  ;;  %p1769_p2 = scmp.lt.s32.totalorder %s1763_s16, %s1763_s16 }
   0x5   :  { %p1770_p3 = por %p1769_p2, %p1768_p1 }
   0x7   :  { %p1771_p4 = pnand %p1770_p3, %p1764_p0 }
   0x9   :  { %1774 = shalt.err (!%p1771_p4)
}
   0xa   :  { %s1801_s17 = smov [#allocation2]  }
   0xb   :  { %38 = dma.vmem_to_smem %s36_s15, 16, %s1801_s17, [#allocation4]  }
   0xc   :  { %1797 = dma.done.wait [#allocation4], 16  }
   0xd   :  { %1798 = vsyncadd [#allocation4], 4294967280 }
   0xe   :  { %48 = sfence }
   0xf   :  { %v1686_v0 = vld [vmem:[%s2552_s2 + $0x4] ss:$12 sps:$4 sm:$0xff]   ;;  %v1802_v1 = vmov 0.0   ;;  %v1688_v2 = vld [vmem:[%s2552_s2 + $0x8] ss:$12 sps:$4 sm:$0xff]   ;;  %vm2561_vm0 = vmmov 0  }
  0x10   :  { %1517 = vmatprep.subr.bf16.mxu1 %v1802_v1  ;;  %1533 = vmatprep.mubr.msk.bf16.mxu1 %vm2561_vm0, %v1802_v1  ;;  %v1689_v3 = vld [vmem:[%s2552_s2] ss:$12 sps:$4 sm:$0xff]   ;;  %v1690_v4 = vld [vmem:[%s2552_s2 + $0x1c] ss:$12 sps:$4 sm:$0xff]   ;;  %v1804_v5 = vmov 0   ;;  %v521_v30 = vld [vmem:[%s2557_s7 + $0x10] sm:$0xff] }
  0x11   :  { %235 = vmatprep.subr.bf16.mxu0 %v1686_v0  ;;  %1518 = vmatpush3.bf16.msra.mxu1 %v1688_v2  ;;  %v1692_v6 = vld [vmem:[%s2552_s2 + $0x20] ss:$12 sps:$4 sm:$0xff]   ;;  %v1693_v7 = vld [vmem:[%s2552_s2 + $0x18] ss:$12 sps:$4 sm:$0xff]   ;;  %v1697_v10 = vld [vmem:[%s2552_s2 + $0x30] ss:$12 sps:$4 sm:$0xff]   ;;  %v86_v0 = vlaneseq }
  0x12   :  { %267 = vmatprep.mubr.bf16.mxu0 %v1804_v5  ;;  %236 = vmatpush1.bf16.msra.mxu0 %v1689_v3  ;;  %v1694_v8 = vld [vmem:[%s2552_s2 + $0x34] ss:$12 sps:$4 sm:$0xff]   ;;  %v1696_v9 = vld [vmem:[%s2552_s2 + $0x38] ss:$12 sps:$4 sm:$0xff]   ;;  %v1700_v12 = vld [vmem:[%s2552_s2 + $0x50] ss:$12 sps:$4 sm:$0xff]  }
  0x13   :  { %1519 = vmatprep.subr.bf16.mxu1 %v1802_v1  ;;  %237 = vmatprep.subr.bf16.mxu0 %v1690_v4  ;;  %v1698_v11 = vld [vmem:[%s2552_s2 + $0x4c] ss:$12 sps:$4 sm:$0xff]   ;;  %v1701_v13 = vld [vmem:[%s2552_s2 + $0x48] ss:$12 sps:$4 sm:$0xff]   ;;  %v1702_v14 = vld [vmem:[%s2552_s2 + $0x64] ss:$12 sps:$4 sm:$0xff]  }
  0x14   :  { %1685 = vset.pattern.permute.xlu1 %v1804_v5  ;;  %1684 = vset.pattern.permute.xlu0 %v1804_v5  ;;  %v1704_v15 = vld [vmem:[%s2552_s2 + $0x68] ss:$12 sps:$4 sm:$0xff]   ;;  %v1705_v16 = vld [vmem:[%s2552_s2 + $0x60] ss:$12 sps:$4 sm:$0xff]   ;;  %v1709_v20 = vld [vmem:[%s2552_s2 + $0x78] ss:$12 sps:$4 sm:$0xff]  }
  0x15   :  { %1520 = vmatpush3.bf16.msra.mxu1 %v1692_v6  ;;  %v1706_v17 = vld [vmem:[%s2552_s2 + $0x7c] ss:$12 sps:$4 sm:$0xff]   ;;  %v1708_v18 = vld [vmem:[%s2552_s2 + $0x80] ss:$12 sps:$4 sm:$0xff]   ;;  %v1712_v24 = vld [vmem:[%s2552_s2 + $0x98] ss:$12 sps:$4 sm:$0xff]  }
  0x16   :  { %238 = vmatpush1.bf16.msra.mxu0 %v1693_v7  ;;  %1521 = vmatprep.subr.bf16.mxu1 %v1802_v1  ;;  %v584_v19 = vld [vmem:[%s2558_s8] sm:$0xff]  ;;  %v585_v23 = vld [vmem:[%s2558_s8 + $0x8] sm:$0xff]  ;;  %v1713_v26 = vld [vmem:[%s2552_s2 + $0x90] ss:$12 sps:$4 sm:$0xff]   ;;  %vm341_vm1 = vcmask 130048   ;;  %v2069_v4 = vshrl.u32 %v86_v0, 7 }
  0x17   :  { %239 = vmatprep.subr.bf16.mxu0 %v1694_v8  ;;  %v519_v21 = vld [vmem:[%s2557_s7] sm:$0xff]  ;;  %595 = vperm.xlu1 %1685, %v584_v19   ;;  %v520_v25 = vld [vmem:[%s2557_s7 + $0x8] sm:$0xff]  ;;  %v522_v28 = vld [vmem:[%s2557_s7 + $0x18] sm:$0xff]  ;;  %v2071_v6 = vand.u32 127, %v86_v0  ;;  %s1456_s20 = sld [smem:[#allocation2 + $0x1]] }
  0x18   :  { %v1710_v22 = vld [vmem:[%s2552_s2 + $0x94] ss:$12 sps:$4 sm:$0xff]   ;;  %530 = vperm.xlu0 %1684, %v519_v21   ;;  %v1714_v27 = vld [vmem:[%s2552_s2 + $0xac] ss:$12 sps:$4 sm:$0xff]   ;;  %v1716_v29 = vld [vmem:[%s2552_s2 + $0xb0] ss:$12 sps:$4 sm:$0xff]  }
  0x19   :  { %1522 = vmatpush3.bf16.msra.mxu1 %v1696_v9  ;;  %v1717_v31 = vld [vmem:[%s2552_s2 + $0xa8] ss:$12 sps:$4 sm:$0xff]   ;;  %v1718_v32 = vld [vmem:[%s2550_s0] sm:$0xff]   ;;  %v587_v33 = vld [vmem:[%s2558_s8 + $0x18] sm:$0xff]  ;;  %v96_v8 = vsub.s32 2, %v2069_v4  ;;  %s1806_s0 = smov [#allocation5]  }
  0x1a   :  { %240 = vmatpush1.bf16.msra.mxu0 %v1697_v10  ;;  %1523 = vmatprep.subr.bf16.mxu1 %v1802_v1  ;;  %v586_v34 = vld [vmem:[%s2558_s8 + $0x10] sm:$0xff]  ;;  %v524_v35 = vld [vmem:[%s2557_s7 + $0x28] sm:$0xff]  ;;  %v523_v36 = vld [vmem:[%s2557_s7 + $0x20] sm:$0xff]  ;;  %s1373_s21 = sshll.u32 %s1806_s0, 4  ;;  %s1374_s21 = int_to_ptr.vmem [resolvable:$true] %s1373_s21 }
  0x1b   :  { %241 = vmatprep.subr.bf16.mxu0 %v1698_v11  ;;  %598 = vperm.xlu1 %1685, %v585_v23   ;;  %v589_v37 = vld [vmem:[%s2558_s8 + $0x28] sm:$0xff]  ;;  %v588_v38 = vld [vmem:[%s2558_s8 + $0x20] sm:$0xff]  ;;  %v526_v39 = vld [vmem:[%s2557_s7 + $0x38] sm:$0xff]  ;;  %v693_v11 = vadd.s32 1, %v2071_v6  ;;  %s1775_s22 = scalar_lea.vmem %s1374_s21, 256  ;;  %p1780_p6 = scmp.lt.s32.totalorder %s1374_s21, %s1374_s21 }
  0x1c   :  { %533 = vperm.xlu0 %1684, %v520_v25   ;;  %v525_v40 = vld [vmem:[%s2557_s7 + $0x30] sm:$0xff]  ;;  %v332_v41 = vld [vmem:[%s2554_s4] sm:$0xff]  ;;  %v333_v42 = vld [vmem:[%s2554_s4 + $0x8] sm:$0xff]  ;;  %p1776_p5 = scmp.ne.s32.totalorder %s1374_s21, %s1775_s22  ;;  %p1781_p7 = scmp.lt.s32.totalorder %s1775_s22, %s1775_s22 }
  0x1d   :  { %1524 = vmatpush3.bf16.msra.mxu1 %v1700_v12  ;;  %v1670_v43 = vpack.c.bf16 %v333_v42, %v332_v41  ;;  %v591_v44 = vld [vmem:[%s2558_s8 + $0x38] sm:$0xff]  ;;  %v590_v45 = vld [vmem:[%s2558_s8 + $0x30] sm:$0xff]  ;;  %v322_v46 = vld [vmem:[%s2551_s1] sm:$0xff]  ;;  %v88_v12 = vsub.s32 0, %v2069_v4 }
  0x1e   :  { %242 = vmatpush1.bf16.msra.mxu0 %v1701_v13  ;;  %1525 = vmatprep.subr.bf16.mxu1 %v1802_v1  ;;  %v323_v47 = vld [vmem:[%s2551_s1 + $0x8] sm:$0xff]  ;;  %v527_v49 = vld [vmem:[%s2557_s7 + $0x40] sm:$0xff]  ;;  %v324_v50 = vld [vmem:[%s2551_s1 + $0x10] sm:$0xff]  ;;  %p1782_p8 = por %p1781_p7, %p1780_p6 }
  0x1f   :  { %243 = vmatprep.subr.bf16.mxu0 %v1702_v14  ;;  %539 = vperm.xlu1 %1685, %v522_v28   ;;  %v528_v48 = vld [vmem:[%s2557_s7 + $0x48] sm:$0xff]  ;;  %v325_v51 = vld [vmem:[%s2551_s1 + $0x18] sm:$0xff]  ;;  %v592_v53 = vld [vmem:[%s2558_s8 + $0x40] sm:$0xff]  ;;  %v92_v14 = vsub.s32 1, %v2069_v4 }
  0x20   :  { %536 = vperm.xlu0 %1684, %v521_v30   ;;  %v593_v52 = vld [vmem:[%s2558_s8 + $0x48] sm:$0xff]  ;;  %v326_v54 = vld [vmem:[%s2551_s1 + $0x20] sm:$0xff]  ;;  %v328_v56 = vld [vmem:[%s2551_s1 + $0x30] sm:$0xff]  ;;  %p1783_p9 = pnand %p1782_p8, %p1776_p5 }
  0x21   :  { %1526 = vmatpush3.bf16.msra.mxu1 %v1704_v15  ;;  %v327_v55 = vld [vmem:[%s2551_s1 + $0x28] sm:$0xff]  ;;  %v329_v57 = vld [vmem:[%s2551_s1 + $0x38] sm:$0xff]  ;;  %v330_v58 = vld [vmem:[%s2551_s1 + $0x40] sm:$0xff]  ;;  %v2085_v15 = vmul.u32 8, %v2071_v6 }
  0x22   :  { %244 = vmatpush1.bf16.msra.mxu0 %v1705_v16  ;;  %1527 = vmatprep.subr.bf16.mxu1 %v1802_v1  ;;  %v331_v59 = vld [vmem:[%s2551_s1 + $0x48] sm:$0xff]  ;;  %v84_v10 = vld [vmem:[%s2553_s3] sm:$0x7]  ;;  %v2087_v16 = vmul.u32 8, %v693_v11 }
  0x23   :  { %245 = vmatprep.subr.bf16.mxu0 %v1706_v17  ;;  %604 = vperm.xlu1 %1685, %v587_v33   ;;  %v97_v13 = vrot.slane %v84_v10, %v96_v8  ;;  %v89_v21 = vrot.slane %v84_v10, %v88_v12  ;;  %v93_v25 = vrot.slane %v84_v10, %v92_v14  ;;  %v662_v33 = vadd.s32 16, %v2069_v4 }
  0x24   :  { %601 = vperm.xlu0 %1684, %v586_v34   ;;  %vm677_vm4 = vcmp.ge.s32.totalorder %v2069_v4, %v2085_v15  ;;  %vm695_vm5 = vcmp.lt.s32.totalorder %v2069_v4, %v2087_v16  ;;  %v669_v10 = vadd.s32 72, %v2069_v4 }
  0x25   :  { %1528 = vmatpush3.bf16.msra.mxu1 %v1708_v18  ;;  %v2094_v18 = vadd.s32 8, %v2069_v4  ;;  %vm2118_vm10 = vmand %vm677_vm4, %vm695_vm5  ;;  %vm679_vm12 = vcmp.ge.s32.totalorder %v662_v33, %v2085_v15  ;;  %vm697_vm13 = vcmp.lt.s32.totalorder %v662_v33, %v2087_v16 }
  0x26   :  { %246 = vmatpush1.bf16.msra.mxu0 %v1709_v20  ;;  %1529 = vmatprep.subr.bf16.mxu1 %v1802_v1  ;;  %vm2151_vm5 = vmand %vm679_vm12, %vm697_vm13 }
  0x27   :  { %247 = vmatprep.subr.bf16.mxu0 %v1710_v22  ;;  %545 = vperm.xlu1 %1685, %v524_v35   ;;  %vm678_vm6 = vcmp.ge.s32.totalorder %v2094_v18, %v2085_v15  ;;  %vm696_vm7 = vcmp.lt.s32.totalorder %v2094_v18, %v2087_v16 }
  0x28   :  { %542 = vperm.xlu0 %1684, %v523_v36   ;;  %vm2125_vm11 = vmand %vm678_vm6, %vm696_vm7 }
  0x29   :  { %1530 = vmatpush3.bf16.msra.mxu1 %v1712_v24 }
  0x2a   :  { %248 = vmatpush1.bf16.msra.mxu0 %v1713_v26  ;;  %1531 = vmatprep.subr.bf16.mxu1 %v1802_v1 }
  0x2b   :  { %249 = vmatprep.subr.bf16.mxu0 %v1714_v27  ;;  %610 = vperm.xlu1 %1685, %v589_v37   ;;  %v663_v37 = vadd.s32 24, %v2069_v4 }
  0x2c   :  { %607 = vperm.xlu0 %1684, %v588_v38  }
  0x2d   :  { %1532 = vmatpush3.bf16.msra.mxu1 %v1716_v29  ;;  %vm680_vm14 = vcmp.ge.s32.totalorder %v663_v37, %v2085_v15  ;;  %vm698_vm15 = vcmp.lt.s32.totalorder %v663_v37, %v2087_v16 }
  0x2e   :  { %250 = vmatpush1.bf16.msra.mxu0 %v1717_v31  ;;  %1674 = vmatprep.subr.bf16.mxu1 %v1670_v43  ;;  %vm2163_vm6 = vmand %vm680_vm14, %vm698_vm15 }
  0x2f   :  { %551 = vperm.xlu1 %1685, %v526_v39   ;;  %1671 = vmatprep.subr.bf16.mxu0 %v1670_v43  ;;  %vm1434_vm15 = vmpackc.low %vm2163_vm6, %vm2151_vm5 }
  0x30   :  { %1534 = vmatmul.mubr.bf16.vlgmr.msra.gmra.mrb[0].mxu1 %v1718_v32  ;;  %548 = vperm.xlu0 %1684, %v525_v40  }
  0x31   :  { %268 = vmatmul.mubr.bf16.vlgmr.msra.gmra.mrb[0].mxu0 %v1718_v32  ;;  %1675 = vmatpush3.bf16.msra.mxu1 %v1670_v43 }
  0x32   :  { %1673 = vmatpush3.bf16.msra.mxu0 %v1670_v43  ;;  %1541 = vmatprep.mubr.msk.f32.mxu0 %vm341_vm1, %v322_v46 }
  0x33   :  { %616 = vperm.xlu1 %1685, %v591_v44   ;;  %1556 = vmatprep.subr.bf16.mxu0 %v1802_v1 }
  0x34   :  { %613 = vperm.xlu0 %1684, %v590_v45   ;;  %1553 = vmatprep.mubr.msk.f32.mxu1 %vm341_vm1, %v330_v58 }
  0x37   :  { %557 = vperm.xlu1 %1685, %v528_v48  }
  0x38   :  { %554 = vperm.xlu0 %1684, %v527_v49   ;;  %1554 = vmatmul.mubr.msk.f32.vlgmr.msra.gmra.mrb[4].mxu1 %vm341_vm1, %v331_v59 }
  0x39   :  { %1542 = vmatmul.mubr.msk.f32.vlgmr.msra.gmra.mrb[4].mxu0 %vm341_vm1, %v323_v47  ;;  %806 = vmatprep.mubr.bf16.mxu1 %v1804_v5 }
  0x3a   :  { %1544 = vmatprep.mubr.msk.f32.mxu0 %vm341_vm1, %v324_v50  ;;  %v664_v50 = vadd.s32 32, %v2069_v4 }
  0x3b   :  { %622 = vperm.xlu1 %1685, %v593_v52  }
  0x3c   :  { %619 = vperm.xlu0 %1684, %v592_v53   ;;  %v666_v53 = vadd.s32 48, %v2069_v4  ;;  %vm699_vm12 = vcmp.lt.s32.totalorder %v664_v50, %v2087_v16 }
  0x3d   :  { %1545 = vmatmul.mubr.msk.f32.gmra.mrb[6].mxu0 %vm341_vm1, %v325_v51  ;;  %v665_v51 = vadd.s32 40, %v2069_v4 }
  0x3e   :  { %1547 = vmatprep.mubr.msk.f32.mxu0 %vm341_vm1, %v326_v54 }
  0x3f   :  { %vm682_vm13 = vcmp.ge.s32.totalorder %v665_v51, %v2085_v15  ;;  %vm700_vm14 = vcmp.lt.s32.totalorder %v665_v51, %v2087_v16 }
  0x41   :  { %1548 = vmatmul.mubr.msk.f32.gmra.mrb[8].mxu0 %vm341_vm1, %v327_v55 }
  0x42   :  { %1550 = vmatprep.mubr.msk.f32.mxu0 %vm341_vm1, %v328_v56  ;;  %v667_v56 = vadd.s32 56, %v2069_v4 }
  0x45   :  { %1551 = vmatmul.mubr.msk.f32.gmra.mrb[10].mxu0 %vm341_vm1, %v329_v57 }
  0x46   :  { %1558 = vmatprep.mubr.msk.bf16.mxu0 %vm2561_vm0, %v1802_v1 }
  0x96   :  { %v596_v60 = vpop.permute.xlu1 %595 }
  0x97   :  { %v531_v61 = vpop.permute.xlu0 %530  ;;  %vm624_vm2 = vcmp.eq.s32.totalorder %v2071_v6, %v596_v60 }
  0x98   :  { %v634_v26 = vsel %vm624_vm2, 1.0, %v1802_v1  ;;  %vm559_vm8 = vcmp.eq.s32.totalorder %v2071_v6, %v531_v61  ;;  %vm1432_vm2 = vmpackc.low %vm2125_vm11, %vm2118_vm10  ;;  %v1805_v61 = vmov 1.0|1.0   ;;  %vm684_vm10 = vcmp.ge.s32.totalorder %v667_v56, %v2085_v15 }
  0x99   :  { %v569_v45 = vsel %vm559_vm8, 1.0, %v1802_v1  ;;  %vm702_vm11 = vcmp.lt.s32.totalorder %v667_v56, %v2087_v16  ;;  %v674_v56 = vadd.s32 112, %v2069_v4 }
  0x9a   :  { %v599_v62 = vpop.permute.xlu1 %598 }
  0x9b   :  { %v534_v63 = vpop.permute.xlu0 %533  ;;  %vm625_vm3 = vcmp.eq.s32.totalorder %v2071_v6, %v599_v62 }
  0x9c   :  { %v635_v27 = vsel %vm625_vm3, 1.0, %v1802_v1  ;;  %vm560_vm9 = vcmp.eq.s32.totalorder %v2071_v6, %v534_v63  ;;  %v668_v63 = vadd.s32 64, %v2069_v4 }
  0x9d   :  { %v644_v42 = vpack.c.bf16 %v635_v27, %v634_v26  ;;  %v570_v49 = vsel %vm560_vm9, 1.0, %v1802_v1  ;;  %vm681_vm9 = vcmp.ge.s32.totalorder %v664_v50, %v2085_v15 }
  0x9e   :  { %v2065_v2 = vpop.permute.xlu1 %539  ;;  %v579_v54 = vpack.c.bf16 %v570_v49, %v569_v45  ;;  %vm685_vm6 = vcmp.ge.s32.totalorder %v668_v63, %v2085_v15 }
  0x9f   :  { %v2067_v3 = vpop.permute.xlu0 %536  ;;  %vm562_vm7 = vcmp.eq.s32.totalorder %v2071_v6, %v2065_v2 }
  0xa0   :  { %vm561_vm8 = vcmp.eq.s32.totalorder %v2071_v6, %v2067_v3  ;;  %v572_v0 = vsel %vm562_vm7, 1.0, %v1802_v1 }
  0xa2   :  { %v2073_v7 = vpop.permute.xlu1 %604 }
  0xa3   :  { %v2076_v9 = vpop.permute.xlu0 %601  ;;  %vm627_vm3 = vcmp.eq.s32.totalorder %v2071_v6, %v2073_v7  ;;  %v571_v7 = vsel %vm561_vm8, 1.0, %v1802_v1 }
  0xa4   :  { %vm626_vm4 = vcmp.eq.s32.totalorder %v2071_v6, %v2076_v9  ;;  %v637_v57 = vsel %vm627_vm3, 1.0, %v1802_v1  ;;  %vm683_vm3 = vcmp.ge.s32.totalorder %v666_v53, %v2085_v15 }
  0xa5   :  { %v636_v58 = vsel %vm626_vm4, 1.0, %v1802_v1  ;;  %vm701_vm4 = vcmp.lt.s32.totalorder %v666_v53, %v2087_v16  ;;  %v672_v53 = vadd.s32 96, %v2069_v4 }
  0xa6   :  { %v2091_v17 = vpop.permute.xlu1 %545  ;;  %v645_v8 = vpack.c.bf16 %v637_v57, %v636_v58  ;;  %v675_v57 = vadd.s32 120, %v2069_v4 }
  0xa7   :  { %v2096_v19 = vpop.permute.xlu0 %542 }
  0xaa   :  { %v2130_v46 = vpop.permute.xlu1 %610 }
  0xab   :  { %v2132_v47 = vpop.permute.xlu0 %607  ;;  %vm629_vm7 = vcmp.eq.s32.totalorder %v2071_v6, %v2130_v46 }
  0xac   :  { %vm628_vm8 = vcmp.eq.s32.totalorder %v2071_v6, %v2132_v47 }
  0xae   :  { %v2176_v59 = vpop.permute.xlu1 %551 }
  0xaf   :  { %v2178_v60 = vpop.permute.xlu0 %548 }
  0xb2   :  { %v617_v14 = vpop.permute.xlu1 %616 }
 0x103   :  { %v312_v20 = vpop.f32.mrb[0].mxu1 }
 0x104   :  { %v313_v22 = vadd.f32 %v312_v20, %v97_v13  ;;  %v269_v23 = vpop.f32.mrb[0].mxu0  ;;  %v1535_v24 = vpop.f32.mrb[1].mxu1 }
 0x105   :  { %v271_v28 = vpop.f32.mrb[1].mxu0  ;;  %v315_v29 = vpop.f32.mrb[2].mxu1  ;;  %v270_v34 = vadd.f32 %v269_v23, %v89_v21  ;;  %v638_v23 = vsel %vm628_vm8, 1.0, %v1802_v1 }
 0x106   :  { %v316_v30 = vadd.f32 %v315_v29, %v97_v13  ;;  %v273_v31 = vpop.f32.mrb[2].mxu0  ;;  %v1536_v32 = vpop.f32.mrb[3].mxu1  ;;  %v272_v38 = vadd.f32 %v271_v28, %v93_v25  ;;  %v580_v13 = vpack.c.bf16 %v572_v0, %v571_v7 }
 0x107   :  { %v274_v35 = vadd.f32 %v273_v31, %v89_v21  ;;  %v275_v36 = vpop.f32.mrb[3].mxu0  ;;  %v614_v20 = vpop.permute.xlu0 %613  ;;  %v670_v21 = vadd.s32 80, %v2069_v4 }
 0x108   :  { %v321_v39 = vpack.c.bf16 %v316_v30, %v313_v22  ;;  %v276_v40 = vadd.f32 %v275_v36, %v93_v25  ;;  %v639_v22 = vsel %vm629_vm7, 1.0, %v1802_v1  ;;  %v558_v31 = vpop.permute.xlu1 %557 }
 0x109   :  { %v319_v43 = vpack.c.bf16 %v274_v35, %v270_v34  ;;  %v646_v30 = vpack.c.bf16 %v639_v22, %v638_v23  ;;  %vm687_vm7 = vcmp.ge.s32.totalorder %v670_v21, %v2085_v15  ;;  %vm705_vm8 = vcmp.lt.s32.totalorder %v670_v21, %v2087_v16 }
 0x10a   :  { %v320_v48 = vpack.c.bf16 %v276_v40, %v272_v38  ;;  %1557 = vmatpush3.bf16.msra.mxu0 %v321_v39 }
 0x10b   :  { %1614 = vmatprep.subr.bf16.mxu0 %v1802_v1  ;;  %v2381_v52 = vpop.f32.mrb[4].mxu1 }
 0x10c   :  { %774 = vmatprep.subr.bf16.mxu1 %v320_v48  ;;  %v2225_v11 = vpop.f32.mrb[4].mxu0  ;;  %v623_v37 = vpop.permute.xlu1 %622 }
 0x10d   :  { %775 = vmatpush1.bf16.msra.mxu1 %v319_v43  ;;  %1559 = vmatmul.mubr.msk.bf16.vlgmr.msra.gmra.mrb[12].mxu0 %vm341_vm1, %v644_v42  ;;  %v2242_v3 = vpop.f32.mrb[5].mxu0  ;;  %v2385_v55 = vpop.f32.mrb[5].mxu1 }
 0x10e   :  { %1562 = vmatprep.mubr.msk.bf16.mxu0 %vm2561_vm0, %v1802_v1  ;;  %1578 = vmatprep.subr.bf16.mxu1 %v1802_v1  ;;  %vm2201_vm0 = vmand %vm681_vm9, %vm699_vm12 }
 0x10f   :  { %vm2227_vm9 = vmand %vm683_vm3, %vm701_vm4  ;;  %vm686_vm3 = vcmp.ge.s32.totalorder %v669_v10, %v2085_v15  ;;  %vm704_vm4 = vcmp.lt.s32.totalorder %v669_v10, %v2087_v16 }
 0x110   :  { %1422 = vmatmul.mubr.msk.bf16.vlgmr.msra.gmra.mrb[8].mxu1 %vm341_vm1, %v579_v54  ;;  %vm2246_vm12 = vmand %vm684_vm10, %vm702_vm11  ;;  %vm563_vm10 = vcmp.eq.s32.totalorder %v2071_v6, %v2096_v19  ;;  %v2275_v24 = vpop.f32.mrb[6].mxu0  ;;  %v671_v19 = vadd.s32 88, %v2069_v4  ;;  %v673_v54 = vadd.s32 104, %v2069_v4 }
 0x111   :  { %816 = vmatprep.mubr.bf16.mxu1 %v1804_v5  ;;  %1579 = vmatpush3.bf16.msk.msra.mxu1 %vm1432_vm2, %v1805_v61  ;;  %vm2220_vm2 = vmand %vm682_vm13, %vm700_vm14  ;;  %vm2579_vm13 = vmmov 0   ;;  %vm703_vm14 = vcmp.lt.s32.totalorder %v668_v63, %v2087_v16  ;;  %v2284_v25 = vpop.f32.mrb[7].mxu0  ;;  %v573_v29 = vsel %vm563_vm10, 1.0, %v1802_v1 }
 0x112   :  { %1580 = vmatprep.subr.bf16.mxu1 %v1802_v1  ;;  %vm1436_vm5 = vmpackc.low %vm2220_vm2, %vm2201_vm0 }
 0x113   :  { %vm1438_vm0 = vmpackc.low %vm2246_vm12, %vm2227_vm9  ;;  %vm566_vm9 = vcmp.eq.s32.totalorder %v2071_v6, %v2176_v59  ;;  %vm565_vm12 = vcmp.eq.s32.totalorder %v2071_v6, %v2178_v60 }
 0x114   :  { %vm2290_vm11 = vmand %vm685_vm6, %vm703_vm14  ;;  %vm706_vm6 = vcmp.lt.s32.totalorder %v671_v19, %v2087_v16  ;;  %vm631_vm14 = vcmp.eq.s32.totalorder %v2071_v6, %v617_v14  ;;  %v576_v39 = vsel %vm566_vm9, 1.0, %v1802_v1  ;;  %v575_v40 = vsel %vm565_vm12, 1.0, %v1802_v1  ;;  %v2373_v49 = vpop.f32.mrb[8].mxu0 }
 0x115   :  { %1563 = vmatmul.mubr.msk.bf16.gmra.mrb[16].mxu0 %vm341_vm1, %v645_v8  ;;  %1581 = vmatpush3.bf16.msk.msra.mxu1 %vm1434_vm15, %v1805_v61  ;;  %vm564_vm15 = vcmp.eq.s32.totalorder %v2071_v6, %v2091_v17  ;;  %vm2303_vm2 = vmand %vm686_vm3, %vm704_vm4  ;;  %v555_v17 = vpop.permute.xlu0 %554  ;;  %v641_v35 = vsel %vm631_vm14, 1.0, %v1802_v1  ;;  %v582_v42 = vpack.c.bf16 %v576_v39, %v575_v40  ;;  %v2375_v50 = vpop.f32.mrb[9].mxu0  ;;  %vm708_vm14 = vcmp.lt.s32.totalorder %v673_v54, %v2087_v16 }
 0x116   :  { %1566 = vmatprep.mubr.msk.bf16.mxu0 %vm2579_vm13, %v1802_v1  ;;  %1582 = vmatprep.subr.bf16.mxu1 %v1802_v1  ;;  %v574_v27 = vsel %vm564_vm15, 1.0, %v1802_v1  ;;  %vm630_vm15 = vcmp.eq.s32.totalorder %v2071_v6, %v614_v20  ;;  %vm1440_vm3 = vmpackc.low %vm2303_vm2, %vm2290_vm11  ;;  %vm633_vm11 = vcmp.eq.s32.totalorder %v2071_v6, %v623_v37  ;;  %vm692_vm9 = vcmp.ge.s32.totalorder %v675_v57, %v2085_v15 }
 0x117   :  { %v581_v32 = vpack.c.bf16 %v574_v27, %v573_v29  ;;  %vm2328_vm4 = vmand %vm687_vm7, %vm705_vm8  ;;  %v640_v36 = vsel %vm630_vm15, 1.0, %v1802_v1  ;;  %vm568_vm7 = vcmp.eq.s32.totalorder %v2071_v6, %v558_v31  ;;  %vm567_vm8 = vcmp.eq.s32.totalorder %v2071_v6, %v555_v17 }
 0x118   :  { %1423 = vmatmul.mubr.msk.bf16.gmra.mrb[12].mxu1 %vm341_vm1, %v580_v13  ;;  %v647_v41 = vpack.c.bf16 %v641_v35, %v640_v36  ;;  %v643_v43 = vsel %vm633_vm11, 1.0, %v1802_v1  ;;  %v578_v45 = vsel %vm568_vm7, 1.0, %v1802_v1  ;;  %v577_v46 = vsel %vm567_vm8, 1.0, %v1802_v1 }
 0x119   :  { %826 = vmatprep.mubr.bf16.mxu1 %v1804_v5  ;;  %1583 = vmatpush3.bf16.msk.msra.mxu1 %vm1436_vm5, %v1805_v61  ;;  %vm688_vm5 = vcmp.ge.s32.totalorder %v671_v19, %v2085_v15  ;;  %v620_v38 = vpop.permute.xlu0 %619  ;;  %v583_v48 = vpack.c.bf16 %v578_v45, %v577_v46  ;;  %vm709_vm12 = vcmp.lt.s32.totalorder %v674_v56, %v2087_v16  ;;  %vm1053_vm8 = vcmask 31744  }
 0x11a   :  { %1584 = vmatprep.subr.bf16.mxu1 %v1802_v1  ;;  %vm2332_vm10 = vmand %vm688_vm5, %vm706_vm6  ;;  %vm632_vm2 = vcmp.eq.s32.totalorder %v2071_v6, %v620_v38  ;;  %vm690_vm5 = vcmp.ge.s32.totalorder %v673_v54, %v2085_v15  ;;  %vm707_vm6 = vcmp.lt.s32.totalorder %v672_v53, %v2087_v16 }
 0x11b   :  { %v642_v44 = vsel %vm632_vm2, 1.0, %v1802_v1 }
 0x11c   :  { %v648_v47 = vpack.c.bf16 %v643_v43, %v642_v44 }
 0x11d   :  { %1567 = vmatmul.mubr.msk.bf16.gmra.mrb[20].mxu0 %vm341_vm1, %v646_v30  ;;  %1585 = vmatpush3.bf16.msk.msra.mxu1 %vm1438_vm0, %v1805_v61  ;;  %vm1442_vm0 = vmpackc.low %vm2332_vm10, %vm2328_vm4  ;;  %vm691_vm10 = vcmp.ge.s32.totalorder %v674_v56, %v2085_v15 }
 0x11e   :  { %1570 = vmatprep.mubr.msk.bf16.mxu0 %vm2579_vm13, %v1802_v1  ;;  %1586 = vmatprep.subr.bf16.mxu1 %v1802_v1  ;;  %vm725_vm11 = vmand %vm691_vm10, %vm709_vm12 }
 0x120   :  { %1424 = vmatmul.mubr.msk.bf16.gmra.mrb[16].mxu1 %vm341_vm1, %v581_v32 }
 0x121   :  { %836 = vmatprep.mubr.bf16.mxu1 %v1804_v5  ;;  %1587 = vmatpush3.bf16.msk.msra.mxu1 %vm1440_vm3, %v1805_v61  ;;  %vm724_vm3 = vmand %vm690_vm5, %vm708_vm14 }
 0x122   :  { %1588 = vmatprep.subr.bf16.mxu1 %v1802_v1 }
 0x125   :  { %1571 = vmatmul.mubr.msk.bf16.gmra.mrb[24].mxu0 %vm341_vm1, %v647_v41  ;;  %1589 = vmatpush3.bf16.msk.msra.mxu1 %vm1442_vm0, %v1805_v61  ;;  %vm710_vm0 = vcmp.lt.s32.totalorder %v675_v57, %v2087_v16 }
 0x126   :  { %1574 = vmatprep.mubr.msk.bf16.mxu0 %vm2579_vm13, %v1802_v1  ;;  %1590 = vmatprep.subr.bf16.mxu1 %v1802_v1  ;;  %vm726_vm2 = vmand %vm692_vm9, %vm710_vm0 }
 0x127   :  { %vm1446_vm7 = vmpackc.low %vm726_vm2, %vm725_vm11 }
 0x128   :  { %1425 = vmatmul.mubr.msk.bf16.gmra.mrb[20].mxu1 %vm341_vm1, %v582_v42 }
 0x129   :  { %846 = vmatprep.mubr.bf16.mxu1 %v1804_v5  ;;  %v2377_v5 = vpop.f32.mrb[10].mxu0 }
 0x12a   :  { %v2379_v51 = vpop.f32.mrb[11].mxu0 }
 0x12d   :  { %1575 = vmatmul.mubr.msk.bf16.gmra.mrb[28].mxu0 %vm341_vm1, %v648_v47 }
 0x12e   :  { %1624 = vmatprep.mubr.msk.bf16.mxu0 %vm2579_vm13, %v1802_v1 }
 0x130   :  { %1426 = vmatmul.mubr.msk.bf16.gmra.mrb[24].mxu1 %vm341_vm1, %v583_v48  ;;  %vm689_vm1 = vcmp.ge.s32.totalorder %v672_v53, %v2085_v15 }
 0x131   :  { %1594 = vmatprep.mubr.msk.bf16.mxu1 %vm2579_vm13, %v1802_v1  ;;  %vm723_vm15 = vmand %vm689_vm1, %vm707_vm6 }
 0x132   :  { %vm1444_vm4 = vmpackc.low %vm724_vm3, %vm723_vm15  ;;  %vm1174_vm3 = vcmask 1041408  }
 0x133   :  { %1591 = vmatpush3.bf16.msk.msra.mxu1 %vm1444_vm4, %v1805_v61  ;;  %vm1114_vm4 = vcmask 654336  }
 0x134   :  { %1592 = vmatprep.subr.bf16.mxu1 %v1802_v1 }
 0x137   :  { %1593 = vmatpush3.bf16.msk.msra.mxu1 %vm1446_vm7, %v1805_v61 }
 0x138   :  { %1650 = vmatprep.subr.bf16.mxu1 %v1802_v1 }
 0x1e0   :  { %v906_v58 = vpop.f32.mrb[12].mxu0 }
 0x1e1   :  { %v1560_v59 = vpop.f32.mrb[13].mxu0 }
 0x1e2   :  { %v909_v60 = vpop.f32.mrb[14].mxu0 }
 0x1e3   :  { %v808_v62 = vpop.f32.mrb[8].mxu1  ;;  %v1561_v15 = vpop.f32.mrb[15].mxu0 }
 0x1e4   :  { %v945_v63 = vmul.f32 %v906_v58, %v808_v62  ;;  %v2401_v0 = vpop.f32.mrb[9].mxu1 }
 0x1e5   :  { %v812_v7 = vpop.f32.mrb[10].mxu1 }
 0x1e6   :  { %v946_v8 = vmul.f32 %v909_v60, %v812_v7  ;;  %v2403_v16 = vpop.f32.mrb[11].mxu1 }
 0x1e8   :  { %v955_v9 = vpack.c.bf16 %v946_v8, %v945_v63  ;;  %v914_v10 = vpop.f32.mrb[16].mxu0  ;;  %v1410_v63 = vld [vmem:[%s2555_s5] ss:$0 sm:$0xff] }
 0x1e9   :  { %v1564_v2 = vpop.f32.mrb[17].mxu0  ;;  %v439_v7 = vadd.f32 %v1410_v63, %v2242_v3  ;;  %v444_v8 = vadd.f32 %v2225_v11, %v1410_v63 }
 0x1ea   :  { %v917_v12 = vpop.f32.mrb[18].mxu0  ;;  %1595 = vmatmul.mubr.bf16.vlgmr.msra.gmra.mrb[28].mxu1 %v955_v9  ;;  %v449_v2 = vadd.f32 %v1410_v63, %v2284_v25 }
 0x1eb   :  { %v818_v61 = vpop.f32.mrb[12].mxu1  ;;  %v1565_v13 = vpop.f32.mrb[19].mxu0  ;;  %1598 = vmatprep.mubr.msk.bf16.mxu1 %vm2579_vm13, %v1802_v1  ;;  %v487_v9 = vmax.f32 %v439_v7, 1e-06 }
 0x1ec   :  { %v947_v14 = vmul.f32 %v914_v10, %v818_v61  ;;  %v2407_v20 = vpop.f32.mrb[13].mxu1  ;;  %v488_v10 = vmax.f32 %v444_v8, 1e-06  ;;  %v489_v61 = vmax.f32 %v449_v2, 1e-06 }
 0x1ed   :  { %v822_v21 = vpop.f32.mrb[14].mxu1  ;;  %1719 = vlog2.f32 %v487_v9 }
 0x1ee   :  { %v948_v22 = vmul.f32 %v917_v12, %v822_v21  ;;  %v2409_v23 = vpop.f32.mrb[15].mxu1  ;;  %1721 = vlog2.f32 %v488_v10  ;;  %v454_v12 = vadd.f32 %v2275_v24, %v1410_v63 }
 0x1ef   :  { %1723 = vlog2.f32 %v489_v61 }
 0x1f0   :  { %v956_v19 = vpack.c.bf16 %v948_v22, %v947_v14  ;;  %v922_v26 = vpop.f32.mrb[20].mxu0  ;;  %v490_v13 = vmax.f32 %v454_v12, 1e-06  ;;  %v459_v14 = vadd.f32 %v1410_v63, %v2375_v50  ;;  %v464_v22 = vadd.f32 %v2373_v49, %v1410_v63 }
 0x1f1   :  { %v1568_v27 = vpop.f32.mrb[21].mxu0  ;;  %v469_v50 = vadd.f32 %v1410_v63, %v2379_v51  ;;  %v474_v49 = vadd.f32 %v2377_v5, %v1410_v63  ;;  %v479_v51 = vadd.f32 %v1410_v63, %v2385_v55  ;;  %v484_v5 = vadd.f32 %v2381_v52, %v1410_v63 }
 0x1f2   :  { %v925_v28 = vpop.f32.mrb[22].mxu0  ;;  %1599 = vmatmul.mubr.bf16.gmra.mrb[32].mxu1 %v956_v19  ;;  %1725 = vlog2.f32 %v490_v13  ;;  %v491_v19 = vmax.f32 %v459_v14, 1e-06 }
 0x1f3   :  { %v828_v29 = vpop.f32.mrb[16].mxu1  ;;  %v1569_v30 = vpop.f32.mrb[23].mxu0  ;;  %1602 = vmatprep.mubr.msk.bf16.mxu1 %vm2579_vm13, %v1802_v1  ;;  %v496_v9 = vmax.f32 %v484_v5, 1e-06 }
 0x1f4   :  { %v949_v31 = vmul.f32 %v922_v26, %v828_v29  ;;  %v2413_v17 = vpop.f32.mrb[17].mxu1  ;;  %v492_v29 = vmax.f32 %v464_v22, 1e-06  ;;  %1727 = vlog2.f32 %v491_v19 }
 0x1f5   :  { %v832_v32 = vpop.f32.mrb[18].mxu1 }
 0x1f6   :  { %v950_v33 = vmul.f32 %v925_v28, %v832_v32  ;;  %v2415_v34 = vpop.f32.mrb[19].mxu1  ;;  %1729 = vlog2.f32 %v492_v29 }
 0x1f7   :  { %v1720_v21 = vpop.eup %1719 }
 0x1f8   :  { %v957_v35 = vpack.c.bf16 %v950_v33, %v949_v31  ;;  %v930_v36 = vpop.f32.mrb[24].mxu0  ;;  %v1722_v3 = vpop.eup %1721  ;;  %v498_v26 = vmul.f32 0.6931472, %v1720_v21 }
 0x1f9   :  { %v1572_v37 = vpop.f32.mrb[25].mxu0  ;;  %v500_v30 = vmul.f32 0.6931472, %v1722_v3 }
 0x1fa   :  { %v933_v38 = vpop.f32.mrb[26].mxu0  ;;  %1603 = vmatmul.mubr.bf16.gmra.mrb[36].mxu1 %v957_v35  ;;  %v1724_v35 = vpop.eup %1723  ;;  %v493_v37 = vmax.f32 %v469_v50, 1e-06 }
 0x1fb   :  { %v838_v39 = vpop.f32.mrb[20].mxu1  ;;  %v1573_v40 = vpop.f32.mrb[27].mxu0  ;;  %1606 = vmatprep.mubr.msk.bf16.mxu1 %vm2579_vm13, %v1802_v1 }
 0x1fc   :  { %v951_v41 = vmul.f32 %v930_v36, %v838_v39  ;;  %v2419_v42 = vpop.f32.mrb[21].mxu1  ;;  %v1726_v36 = vpop.eup %1725  ;;  %v502_v39 = vmul.f32 0.6931472, %v1724_v35  ;;  %1731 = vlog2.f32 %v493_v37 }
 0x1fd   :  { %v842_v43 = vpop.f32.mrb[22].mxu1 }
 0x1fe   :  { %v952_v44 = vmul.f32 %v933_v38, %v842_v43  ;;  %v2421_v45 = vpop.f32.mrb[23].mxu1  ;;  %v494_v43 = vmax.f32 %v474_v49, 1e-06 }
 0x200   :  { %v958_v46 = vpack.c.bf16 %v952_v44, %v951_v41  ;;  %v938_v47 = vpop.f32.mrb[28].mxu0  ;;  %1733 = vlog2.f32 %v494_v43 }
 0x201   :  { %v1576_v48 = vpop.f32.mrb[29].mxu0 }
 0x202   :  { %v941_v53 = vpop.f32.mrb[30].mxu0  ;;  %1607 = vmatmul.mubr.bf16.gmra.mrb[40].mxu1 %v958_v46  ;;  %v504_v46 = vmul.f32 0.6931472, %v1726_v36 }
 0x203   :  { %v848_v54 = vpop.f32.mrb[24].mxu1  ;;  %v1577_v56 = vpop.f32.mrb[31].mxu0  ;;  %1610 = vmatprep.mubr.msk.bf16.mxu1 %vm2579_vm13, %v1802_v1 }
 0x204   :  { %v953_v57 = vmul.f32 %v938_v47, %v848_v54  ;;  %v2425_v58 = vpop.f32.mrb[25].mxu1  ;;  %v1728_v56 = vpop.eup %1727 }
 0x205   :  { %v852_v59 = vpop.f32.mrb[26].mxu1 }
 0x206   :  { %v954_v60 = vmul.f32 %v941_v53, %v852_v59  ;;  %v2427_v62 = vpop.f32.mrb[27].mxu1  ;;  %v495_v59 = vmax.f32 %v479_v51, 1e-06 }
 0x208   :  { %v959_v15 = vpack.c.bf16 %v954_v60, %v953_v57  ;;  %v1730_v57 = vpop.eup %1729  ;;  %1735 = vlog2.f32 %v495_v59 }
 0x209   :  { %v508_v2 = vmul.f32 0.6931472, %v1730_v57  ;;  %v1732_v14 = vpop.eup %1731  ;;  %1737 = vlog2.f32 %v496_v9 }
 0x20a   :  { %1611 = vmatmul.mubr.bf16.gmra.mrb[44].mxu1 %v959_v15  ;;  %v506_v15 = vmul.f32 0.6931472, %v1728_v56  ;;  %v1734_v19 = vpop.eup %1733 }
 0x20b   :  { %1660 = vmatprep.mubr.msk.bf16.mxu1 %vm2579_vm13, %v1802_v1 }
 0x212   :  { %v1736_v37 = vpop.eup %1735 }
 0x2bd   :  { %v994_v11 = vpop.f32.mrb[28].mxu1 }
 0x2be   :  { %v1033_v27 = vmul.f32 0.35355338, %v994_v11  ;;  %v1596_v28 = vpop.f32.mrb[29].mxu1 }
 0x2bf   :  { %v997_v25 = vpop.f32.mrb[30].mxu1 }
 0x2c0   :  { %v2440_v31 = vadd.f32 %v1033_v27, %v498_v26  ;;  %v1034_v24 = vmul.f32 0.35355338, %v997_v25  ;;  %v1597_v32 = vpop.f32.mrb[31].mxu1  ;;  %v510_v27 = vmul.f32 0.6931472, %v1732_v14 }
 0x2c2   :  { %v2443_v33 = vadd.f32 %v1034_v24, %v500_v30  ;;  %v1054_v13 = vsel %vm1053_vm8, %v2440_v31, -inf  ;;  %v512_v30 = vmul.f32 0.6931472, %v1734_v19 }
 0x2c4   :  { %v1055_v22 = vsel %vm1053_vm8, %v2443_v33, -inf }
 0x2c5   :  { %v1002_v38 = vpop.f32.mrb[32].mxu1 }
 0x2c6   :  { %v1035_v40 = vmul.f32 0.35355338, %v1002_v38  ;;  %v1600_v41 = vpop.f32.mrb[33].mxu1 }
 0x2c7   :  { %v1005_v44 = vpop.f32.mrb[34].mxu1  ;;  %v1738_v41 = vpop.eup %1737 }
 0x2c8   :  { %v2446_v47 = vadd.f32 %v1035_v40, %v502_v39  ;;  %v1036_v48 = vmul.f32 0.35355338, %v1005_v44  ;;  %v1601_v53 = vpop.f32.mrb[35].mxu1  ;;  %v516_v5 = vmul.f32 0.6931472, %v1738_v41 }
 0x2ca   :  { %v2449_v54 = vadd.f32 %v1036_v48, %v504_v46  ;;  %v1056_v35 = vsel %vm1053_vm8, %v2446_v47, -inf  ;;  %v514_v46 = vmul.f32 0.6931472, %v1736_v37 }
 0x2cc   :  { %v1057_v39 = vsel %vm1053_vm8, %v2449_v54, -inf }
 0x2cd   :  { %v1010_v60 = vpop.f32.mrb[36].mxu1 }
 0x2ce   :  { %v1037_v7 = vmul.f32 0.35355338, %v1010_v60  ;;  %v1604_v8 = vpop.f32.mrb[37].mxu1 }
 0x2cf   :  { %v1013_v10 = vpop.f32.mrb[38].mxu1 }
 0x2d0   :  { %v2452_v12 = vadd.f32 %v1037_v7, %v506_v15  ;;  %v1038_v61 = vmul.f32 0.35355338, %v1013_v10  ;;  %v1605_v55 = vpop.f32.mrb[39].mxu1 }
 0x2d2   :  { %v1058_v52 = vsel %vm1053_vm8, %v2452_v12, -inf  ;;  %v2458_v63 = vadd.f32 %v1038_v61, %v508_v2 }
 0x2d3   :  { %v1059_v21 = vmax.f32 %v1054_v13, %v1058_v52 }
 0x2d4   :  { %v1060_v3 = vsel %vm1053_vm8, %v2458_v63, -inf }
 0x2d5   :  { %v1061_v11 = vmax.f32 %v1055_v22, %v1060_v3  ;;  %v1018_v26 = vpop.f32.mrb[40].mxu1 }
 0x2d6   :  { %v1039_v28 = vmul.f32 0.35355338, %v1018_v26  ;;  %v1608_v29 = vpop.f32.mrb[41].mxu1 }
 0x2d7   :  { %v1021_v25 = vpop.f32.mrb[42].mxu1 }
 0x2d8   :  { %v1049_v24 = vadd.f32 %v1039_v28, %v510_v27  ;;  %v1040_v32 = vmul.f32 0.35355338, %v1021_v25  ;;  %v1609_v50 = vpop.f32.mrb[43].mxu1 }
 0x2da   :  { %v1062_v49 = vsel %vm1053_vm8, %v1049_v24, -inf  ;;  %v1050_v36 = vadd.f32 %v1040_v32, %v512_v30 }
 0x2db   :  { %v1063_v38 = vmax.f32 %v1056_v35, %v1062_v49 }
 0x2dc   :  { %v1064_v40 = vsel %vm1053_vm8, %v1050_v36, -inf }
 0x2dd   :  { %v1065_v43 = vmax.f32 %v1057_v39, %v1064_v40  ;;  %v1026_v44 = vpop.f32.mrb[44].mxu1 }
 0x2de   :  { %v1041_v48 = vmul.f32 0.35355338, %v1026_v44  ;;  %v1612_v53 = vpop.f32.mrb[45].mxu1 }
 0x2df   :  { %v1071_v51 = vmax.f32 %v1063_v38, %v1065_v43  ;;  %v1029_v56 = vpop.f32.mrb[46].mxu1 }
 0x2e0   :  { %v1051_v57 = vadd.f32 %v1041_v48, %v514_v46  ;;  %v1042_v59 = vmul.f32 0.35355338, %v1029_v56  ;;  %v1613_v60 = vpop.f32.mrb[47].mxu1  ;;  %v751_v48 = vmul.u32 16, %v2069_v4 }
 0x2e2   :  { %v1066_v15 = vsel %vm1053_vm8, %v1051_v57, -inf  ;;  %v1052_v7 = vadd.f32 %v1042_v59, %v516_v5  ;;  %vm752_vm1 = vcmp.ge.s32.totalorder %v2071_v6, %v751_v48 }
 0x2e3   :  { %v1067_v8 = vmax.f32 %v1059_v21, %v1066_v15 }
 0x2e4   :  { %v1068_v9 = vsel %vm1053_vm8, %v1052_v7, -inf }
 0x2e5   :  { %v1069_v10 = vmax.f32 %v1061_v11, %v1068_v9 }
 0x2e7   :  { %v1070_v2 = vmax.f32 %v1067_v8, %v1069_v10 }
 0x2e9   :  { %v1072_v61 = vmax.f32 %v1070_v2, %v1071_v51 }
 0x2eb   :  { %v1073_v55 = vrot.slane %v1072_v61, 4 }
 0x2ed   :  { %v1074_v13 = vmax.f32 %v1072_v61, %v1073_v55 }
 0x2ef   :  { %v1075_v52 = vrot.slane %v1074_v13, 2 }
 0x2f1   :  { %v1076_v14 = vmax.f32 %v1074_v13, %v1075_v52 }
 0x2f3   :  { %v1077_v22 = vrot.slane %v1076_v14, 1 }
 0x2f5   :  { %v1078_v3 = vmax.f32 %v1076_v14, %v1077_v22 }
 0x2f7   :  { %v1088_v19 = vsub.f32 %v1052_v7, %v1078_v3  ;;  %v1079_v26 = vsub.f32 %v2440_v31, %v1078_v3  ;;  %v1080_v27 = vsub.f32 %v2443_v33, %v1078_v3  ;;  %v1081_v28 = vsub.f32 %v2446_v47, %v1078_v3  ;;  %v1421_v7 = vld [vmem:[%s2559_s9] ss:$0 sm:$0xff]  ;;  %s1358_s9 = sld [smem:[#allocation2]] }
 0x2f8   :  { %v1082_v21 = vsub.f32 %v2449_v54, %v1078_v3  ;;  %v1083_v29 = vsub.f32 %v2452_v12, %v1078_v3  ;;  %v1084_v11 = vsub.f32 %v2458_v63, %v1078_v3  ;;  %v1085_v25 = vsub.f32 %v1049_v24, %v1078_v3 }
 0x2f9   :  { %v1107_v30 = vmul.f32 1.442695, %v1088_v19  ;;  %v1089_v32 = vmul.f32 1.442695, %v1079_v26  ;;  %v1091_v50 = vmul.f32 1.442695, %v1080_v27  ;;  %v1086_v35 = vsub.f32 %v1050_v36, %v1078_v3 }
 0x2fa   :  { %v1093_v49 = vmul.f32 1.442695, %v1081_v28  ;;  %v1087_v37 = vsub.f32 %v1051_v57, %v1078_v3  ;;  %v1095_v38 = vmul.f32 1.442695, %v1082_v21  ;;  %v1097_v31 = vmul.f32 1.442695, %v1083_v29 }
 0x2fb   :  { %1739 = vpow2.f32 %v1107_v30  ;;  %v1099_v33 = vmul.f32 1.442695, %v1084_v11  ;;  %v1101_v47 = vmul.f32 1.442695, %v1085_v25  ;;  %v1103_v54 = vmul.f32 1.442695, %v1086_v35 }
 0x2fc   :  { %1741 = vpow2.f32 %v1089_v32  ;;  %v1105_v12 = vmul.f32 1.442695, %v1087_v37  ;;  %v753_v36 = vadd.s32 1, %v2069_v4  ;;  %vm657_vm14 = vcmp.eq.s32.totalorder %v2069_v4, %v1421_v7 }
 0x2fd   :  { %1743 = vpow2.f32 %v1091_v50  ;;  %vm658_vm15 = vcmp.eq.s32.totalorder %v2094_v18, %v1421_v7 }
 0x2fe   :  { %1745 = vpow2.f32 %v1093_v49  ;;  %v754_v53 = vmul.u32 16, %v753_v36  ;;  %v660_v9 = vsel %vm658_vm15, 1.0, %v1802_v1 }
 0x2ff   :  { %1747 = vpow2.f32 %v1095_v38 }
 0x300   :  { %1749 = vpow2.f32 %v1097_v31  ;;  %vm755_vm5 = vcmp.lt.s32.totalorder %v2071_v6, %v754_v53  ;;  %v659_v6 = vsel %vm657_vm14, 1.0, %v1802_v1 }
 0x301   :  { %1751 = vpow2.f32 %v1099_v33  ;;  %vm756_vm6 = vmand %vm752_vm1, %vm755_vm5  ;;  %v2494_v2 = vpack.c.bf16 %v660_v9, %v659_v6 }
 0x302   :  { %1753 = vpow2.f32 %v1101_v47  ;;  %v757_v8 = vsel %vm756_vm6, 1.0, %v1802_v1 }
 0x303   :  { %1755 = vpow2.f32 %v1103_v54  ;;  %v758_v10 = vpack.c.bf16 %v757_v8, %v757_v8 }
 0x304   :  { %1757 = vpow2.f32 %v1105_v12 }
 0x305   :  { %v1740_v63 = vpop.eup %1739  ;;  %v2497_v4 = vsel %vm1174_vm3, %v758_v10, 0 }
 0x306   :  { %v1742_v24 = vpop.eup %1741 }
 0x307   :  { %v1744_v39 = vpop.eup %1743 }
 0x308   :  { %v1746_v40 = vpop.eup %1745  ;;  %v1109_v41 = vpack.c.bf16 %v1744_v39, %v1742_v24 }
 0x309   :  { %v1748_v43 = vpop.eup %1747 }
 0x30a   :  { %v1750_v44 = vpop.eup %1749  ;;  %1615 = vmatpush3.bf16.msra.mxu0 %v1109_v41  ;;  %v1110_v46 = vpack.c.bf16 %v1748_v43, %v1746_v40 }
 0x30b   :  { %v1752_v51 = vpop.eup %1751  ;;  %1616 = vmatprep.subr.bf16.mxu0 %v1802_v1 }
 0x30c   :  { %v1754_v56 = vpop.eup %1753  ;;  %v1111_v5 = vpack.c.bf16 %v1752_v51, %v1750_v44  ;;  %v1359_v51 = vstv %s1358_s9 }
 0x30d   :  { %v1756_v57 = vpop.eup %1755 }
 0x30e   :  { %v1758_v59 = vpop.eup %1757  ;;  %1617 = vmatpush3.bf16.msra.mxu0 %v1110_v46  ;;  %v1112_v60 = vpack.c.bf16 %v1756_v57, %v1754_v56  ;;  %v1363_v57 = vstv %s1456_s20 }
 0x30f   :  { %1618 = vmatprep.subr.bf16.mxu0 %v1802_v1  ;;  %v1113_v15 = vpack.c.bf16 %v1740_v63, %v1758_v59 }
 0x312   :  { %1619 = vmatpush3.bf16.msra.mxu0 %v1111_v5 }
 0x313   :  { %1620 = vmatprep.subr.bf16.mxu0 %v1802_v1 }
 0x316   :  { %1621 = vmatpush3.bf16.msra.mxu0 %v1112_v60 }
 0x317   :  { %1622 = vmatprep.subr.bf16.mxu0 %v1802_v1 }
 0x31a   :  { %1623 = vmatpush3.bf16.msra.mxu0 %v1113_v15 }
 0x31b   :  { %1628 = vmatprep.subr.bf16.mxu0 %v1802_v1 }
 0x31d   :  { %1625 = vmatmul.mubr.msk.bf16.vlgmr.msra.gmra.mrb[32].mxu0 %vm1114_vm4, %v2494_v2 }
 0x31e   :  { %1629 = vmatpush3.bf16.msra.mxu0 %v2497_v4  ;;  %1630 = vmatprep.mubr.msk.bf16.mxu0 %vm2579_vm13, %v1802_v1 }
 0x325   :  { %1631 = vmatmul.mubr.msk.bf16.vlgmr.msra.gmra.mrb[36].mxu0 %vm1053_vm8, %v1109_v41 }
 0x326   :  { %1634 = vmatprep.mubr.msk.bf16.mxu0 %vm2579_vm13, %v1802_v1 }
 0x32d   :  { %1635 = vmatmul.mubr.msk.bf16.gmra.mrb[40].mxu0 %vm1053_vm8, %v1110_v46 }
 0x32e   :  { %1638 = vmatprep.mubr.msk.bf16.mxu0 %vm2579_vm13, %v1802_v1 }
 0x335   :  { %1639 = vmatmul.mubr.msk.bf16.gmra.mrb[44].mxu0 %vm1053_vm8, %v1111_v5 }
 0x336   :  { %1642 = vmatprep.mubr.msk.bf16.mxu0 %vm2579_vm13, %v1802_v1 }
 0x33d   :  { %1643 = vmatmul.mubr.msk.bf16.gmra.mrb[48].mxu0 %vm1053_vm8, %v1112_v60 }
 0x33e   :  { %1646 = vmatprep.mubr.msk.bf16.mxu0 %vm2579_vm13, %v1802_v1 }
 0x345   :  { %1647 = vmatmul.mubr.msk.bf16.gmra.mrb[52].mxu0 %vm1053_vm8, %v1113_v15 }
 0x3f0   :  { %v1152_v18 = vpop.f32.mrb[32].mxu0 }
 0x3f1   :  { %v1307_v61 = vmax.f32 %v1152_v18, 1e-30  ;;  %v1626_v55 = vpop.f32.mrb[33].mxu0 }
 0x3f2   :  { %v1155_v13 = vpop.f32.mrb[34].mxu0 }
 0x3f3   :  { %v1308_v52 = vmax.f32 %v1155_v13, 1e-30  ;;  %v1627_v14 = vpop.f32.mrb[35].mxu0  ;;  %1759 = vrcp.f32 %v1307_v61 }
 0x3f5   :  { %1761 = vrcp.f32 %v1308_v52 }
 0x3f8   :  { %v1212_v22 = vpop.f32.mrb[36].mxu0 }
 0x3f9   :  { %v1251_v3 = vmul.f32 %v1212_v22, %v2401_v0  ;;  %v1632_v19 = vpop.f32.mrb[37].mxu0 }
 0x3fa   :  { %v1215_v26 = vpop.f32.mrb[38].mxu0 }
 0x3fb   :  { %v1252_v27 = vmul.f32 %v1215_v26, %v2403_v16  ;;  %v1633_v28 = vpop.f32.mrb[39].mxu0 }
 0x3fd   :  { %v1261_v21 = vpack.c.bf16 %v1252_v27, %v1251_v3  ;;  %v1760_v29 = vpop.eup %1759 }
 0x3ff   :  { %v1762_v11 = vpop.eup %1761  ;;  %1651 = vmatpush3.bf16.msra.mxu1 %v1261_v21 }
 0x400   :  { %v1220_v25 = vpop.f32.mrb[40].mxu0  ;;  %1652 = vmatprep.subr.bf16.mxu1 %v1802_v1  ;;  %v1311_v30 = vpack.c.bf16 %v1762_v11, %v1760_v29 }
 0x401   :  { %v1253_v32 = vmul.f32 %v1220_v25, %v2407_v20  ;;  %v1636_v50 = vpop.f32.mrb[41].mxu0 }
 0x402   :  { %v1223_v35 = vpop.f32.mrb[42].mxu0 }
 0x403   :  { %v1254_v49 = vmul.f32 %v1223_v35, %v2409_v23  ;;  %v1637_v0 = vpop.f32.mrb[43].mxu0 }
 0x405   :  { %v1262_v37 = vpack.c.bf16 %v1254_v49, %v1253_v32 }
 0x407   :  { %1653 = vmatpush3.bf16.msra.mxu1 %v1262_v37 }
 0x408   :  { %v1228_v38 = vpop.f32.mrb[44].mxu0  ;;  %1654 = vmatprep.subr.bf16.mxu1 %v1802_v1 }
 0x409   :  { %v1255_v16 = vmul.f32 %v1228_v38, %v2413_v17  ;;  %v1640_v31 = vpop.f32.mrb[45].mxu0 }
 0x40a   :  { %v1231_v33 = vpop.f32.mrb[46].mxu0 }
 0x40b   :  { %v1256_v47 = vmul.f32 %v1231_v33, %v2415_v34  ;;  %v1641_v54 = vpop.f32.mrb[47].mxu0 }
 0x40d   :  { %v1263_v12 = vpack.c.bf16 %v1256_v47, %v1255_v16 }
 0x40f   :  { %1655 = vmatpush3.bf16.msra.mxu1 %v1263_v12 }
 0x410   :  { %v1236_v20 = vpop.f32.mrb[48].mxu0  ;;  %1656 = vmatprep.subr.bf16.mxu1 %v1802_v1 }
 0x411   :  { %v1257_v23 = vmul.f32 %v1236_v20, %v2419_v42  ;;  %v1644_v63 = vpop.f32.mrb[49].mxu0 }
 0x412   :  { %v1239_v24 = vpop.f32.mrb[50].mxu0 }
 0x413   :  { %v1258_v36 = vmul.f32 %v1239_v24, %v2421_v45  ;;  %v1645_v39 = vpop.f32.mrb[51].mxu0 }
 0x415   :  { %v1264_v40 = vpack.c.bf16 %v1258_v36, %v1257_v23 }
 0x417   :  { %1657 = vmatpush3.bf16.msra.mxu1 %v1264_v40 }
 0x418   :  { %v1244_v17 = vpop.f32.mrb[52].mxu0  ;;  %1658 = vmatprep.subr.bf16.mxu1 %v1802_v1 }
 0x419   :  { %v1259_v34 = vmul.f32 %v1244_v17, %v2425_v58  ;;  %v1648_v41 = vpop.f32.mrb[53].mxu0 }
 0x41a   :  { %v1247_v43 = vpop.f32.mrb[54].mxu0 }
 0x41b   :  { %v1260_v44 = vmul.f32 %v1247_v43, %v2427_v62  ;;  %v1649_v46 = vpop.f32.mrb[55].mxu0 }
 0x41d   :  { %v1265_v48 = vpack.c.bf16 %v1260_v44, %v1259_v34 }
 0x41f   :  { %1659 = vmatpush3.bf16.msra.mxu1 %v1265_v48 }
 0x420   :  { %1664 = vmatprep.subr.bf16.mxu1 %v1802_v1 }
 0x422   :  { %1661 = vmatmul.mubr.msk.bf16.vlgmr.msra.gmra.mrb[48].mxu1 %vm1114_vm4, %v2494_v2 }
 0x423   :  { %1665 = vmatpush3.bf16.msra.mxu1 %v2497_v4  ;;  %1666 = vmatprep.mubr.msk.bf16.mxu1 %vm2579_vm13, %v1802_v1 }
 0x42a   :  { %1667 = vmatmul.mubr.msk.bf16.vlgmr.msra.gmra.mrb[52].mxu1 %vm1053_vm8, %v1311_v30 }
 0x4f5   :  { %v1300_v42 = vpop.f32.mrb[48].mxu1 }
 0x4f6   :  { %v1662_v45 = vpop.f32.mrb[49].mxu1 }
 0x4f7   :  { %v1303_v58 = vpop.f32.mrb[50].mxu1 }
 0x4f8   :  { %v1663_v62 = vpop.f32.mrb[51].mxu1 }
 0x4fd   :  { %v1349_v53 = vpop.f32.mrb[52].mxu1 }
 0x4fe   :  { %v1356_v56 = vmul.f32 %v1349_v53, %v1300_v42  ;;  %v1668_v5 = vpop.f32.mrb[53].mxu1 }
 0x4ff   :  { %v1352_v59 = vpop.f32.mrb[54].mxu1 }
 0x500   :  { %v1360_v60 = vmul.f32 %v1359_v51, %v1356_v56  ;;  %v1357_v15 = vmul.f32 %v1352_v59, %v1303_v58  ;;  %v1669_v7 = vpop.f32.mrb[55].mxu1 }
 0x502   :  { %v1364_v1 = vadd.f32 %v1363_v57, %v1360_v60  ;;  %v1361_v8 = vmul.f32 %v1359_v51, %v1357_v15 }
 0x504   :  { %1366 = vst [vmem:[#allocation5] sm:$0xff] %v1364_v1  ;;  %v1365_v9 = vadd.f32 %v1363_v57, %v1361_v8 }
 0x506   :  { %1367 = vst [vmem:[#allocation5 + $0x8] sm:$0xff] %v1365_v9 }
 0x507   :  { %1786 = shalt.err (!%p1783_p9)
}
 0x508   :  { %s1787_s25 = scalar_lea.hbm %s2560_s10, 256 }
 0x509   :  { %p1788_p10 = scmp.ne.s32.totalorder %s2560_s10, %s1787_s25  ;;  %p1791_p11 = scmp.lt.u32.totalorder %s1787_s25, %s2560_s10 }
 0x50b   :  { %p1793_p12 = pnand %p1791_p11, %p1788_p10 }
 0x50d   :  { %1796 = shalt.err (!%p1793_p12)
}
 0x50e   :  { %s1807_s29 = smov 128   ;;  %s1808_s30 = smov 8  }
 0x50f   :  { %1379 = dma.vmem_to_hbm [thread:$0]  %s1374_s21, 256, %s2560_s10, [#allocation3], %s1807_s29, %s1807_s29, %s1808_s30  }
 0x510   :  { %1799 = dma.done.wait [#allocation3], 256  }
 0x511   :  { %1800 = vsyncadd [#allocation3], 4294967040 }
 0x512   :  { %1383 = vsyncpa [#allocation3], 1 }
 0x513   :  { %1384 = vsyncpa [#allocation4], 1 }

</bundles_post_ra>
